<compile_context>
chip_gen: v5e
topology: v5e:2x2
jax: 0.10.0
libtpu: 0.0.40
codegen_flags: <defaults>
</compile_context>

<pallas_src>
import jax
import jax.numpy as jnp
from jax.experimental import pallas as pl
from jax.experimental.pallas import tpu as pltpu


def _round_up(x, m):
    return (x + m - 1) // m * m


def _cdiv(a, b):
    return -(-a // b)


def _head_scalar_kernel(x_ref, w_ref, b_ref, o_ref):
    # num_classes == 1: VPU multiply + XLU lane reduce (no MXU lane padding).
    # x_ref: (TB, E)   w_ref: (1, E)   b_ref: SMEM (1, 1)   o_ref: (TB, 1)
    xf = x_ref[...].astype(jnp.float32)
    wf = w_ref[...].astype(jnp.float32)          # broadcast over the batch tile
    acc = jnp.sum(xf * wf, axis=-1, keepdims=True) + b_ref[0, 0]
    o_ref[...] = acc.astype(o_ref.dtype)


def _head_matmul_kernel(x_ref, w_ref, b_ref, o_ref):
    # num_classes > 1: MXU path with f32 accumulation.
    # x_ref: (TB, E)   w_ref: (E, C)   b_ref: VMEM (1, C)   o_ref: (TB, C)
    acc = jnp.dot(x_ref[...], w_ref[...], preferred_element_type=jnp.float32)
    o_ref[...] = (acc + b_ref[...]).astype(o_ref.dtype)


def text_regressor_decode(encoded_sentences, weight_t, bias, *,
                          max_tile_b=None,
                          vmem_block_budget_bytes=40 << 20,
                          split_threshold_bytes=8 << 20):
    """logits = encoded_sentences @ weight_t + bias, then .squeeze().

    encoded_sentences: [B, E]  (f32 or bf16; bf16 is the documented fast path —
                       cast should be fused into the encoder's output, not done
                       as a standalone convert)
    weight_t:          [E, C]  (PyTorch Linear weight, transposed)
    bias:              [C]
    returns:           f32 logits, squeezed like torch ([B] when C == 1;
                       0-d scalar when B == 1 and C == 1).

    Notes: for C > 1 with bf16 activations the (tiny) weight is cast to bf16 so
    the MXU runs bf16×bf16 with f32 accumulation — a deliberate, documented
    divergence from a pure-f32 torch reference. For C == 1 everything is
    computed in f32 on the VPU.
    """
    x = encoded_sentences
    B, E = x.shape
    E2, C = weight_t.shape
    assert E == E2, "weight_t must be [embedding_length, num_classes]"
    assert bias.shape == (C,)

    out_dtype = jnp.float32                       # match PyTorch Linear output
    x_isz = jnp.dtype(x.dtype).itemsize
    o_isz = 4

    E_lane = _round_up(E, 128)                    # lane padding of the x block
    C_lane = _round_up(C, 128)                    # lane padding of the out block

    # ---- batch tile from the VMEM budget (2 x-bufs + 2 out-bufs) -------------
    per_row = 2 * E_lane * x_isz + 2 * C_lane * o_isz
    tile_b = max(8, (vmem_block_budget_bytes // per_row) // 8 * 8)
    if max_tile_b is not None:
        tile_b = min(tile_b, max(8, (max_tile_b // 8) * 8))
    # v7x megacore: keep >= 2 parallel blocks once the x stream is big enough
    # to be worth splitting across both TensorCores (no effect on v5e/v6e).
    if B >= 16 and B * E_lane * x_isz >= 2 * split_threshold_bytes:
        tile_b = min(tile_b, _round_up(_cdiv(B, 2), 8))
    if tile_b >= B:
        tile_b = B                                # single full-extent block
    num_blocks = _cdiv(B, tile_b)                 # partial tail handled by Pallas

    # ---- per-case operand prep + block specs ---------------------------------
    scalar_head = (C == 1)
    if scalar_head:
        w_arg = weight_t.reshape(1, E)            # lane-major weight row
        w_spec = pl.BlockSpec((1, E), lambda i: (0, 0))
        b_arg = bias.reshape(1, 1).astype(jnp.float32)
        b_spec = pl.BlockSpec(memory_space=pltpu.MemorySpace.SMEM)
        kernel = _head_scalar_kernel
    else:
        w_arg = weight_t.astype(x.dtype)          # tiny; match activation dtype
        w_spec = pl.BlockSpec((E, C), lambda i: (0, 0))
        b_arg = bias.reshape(1, C).astype(jnp.float32)
        b_spec = pl.BlockSpec((1, C), lambda i: (0, 0))
        kernel = _head_matmul_kernel
    w_isz = jnp.dtype(w_arg.dtype).itemsize

    x_spec = pl.BlockSpec((tile_b, E), lambda i: (i, 0))
    out_spec = pl.BlockSpec((tile_b, C), lambda i: (i, 0))

    # ---- explicit VMEM limit: working set + small slack, no 32 MiB floor -----
    tb_pad = _round_up(tile_b, 8)
    x_buf = 2 * tb_pad * E_lane * x_isz
    o_buf = 2 * tb_pad * C_lane * o_isz
    if scalar_head:
        w_buf = 2 * 8 * E_lane * w_isz
        b_buf = 0                                  # bias lives in SMEM
    else:
        w_buf = 2 * _round_up(E, 8) * C_lane * w_isz
        b_buf = 2 * 8 * C_lane * 4
    vmem_limit = int(min(x_buf + o_buf + w_buf + b_buf + (4 << 20), 56 << 20))

    cost = pl.CostEstimate(
        flops=2 * B * E * C,
        transcendentals=0,
        bytes_accessed=B * E * x_isz + E * C * w_isz + C * 4 + B * C * o_isz,
    )

    out = pl.pallas_call(
        kernel,
        out_shape=jax.ShapeDtypeStruct((B, C), out_dtype),
        grid_spec=pltpu.PrefetchScalarGridSpec(
            num_scalar_prefetch=0,
            grid=(num_blocks,),
            in_specs=[x_spec, w_spec, b_spec],
            out_specs=out_spec,
        ),
        compiler_params=pltpu.CompilerParams(
            dimension_semantics=("parallel",),
            vmem_limit_bytes=vmem_limit,
        ),
        cost_estimate=cost,
    )(x, w_arg, b_arg)

    # Mirrors torch .squeeze() on the [B, num_classes] logits.
    return jnp.squeeze(out)


def init_params(key, embedding_length, num_classes, dtype=jnp.float32):
    """Matches the PyTorch module: xavier_uniform_ decoder weight, default
    Linear bias init. Weight is returned transposed ([E, C]) for the kernel."""
    kw, kb = jax.random.split(key)
    limit_w = (6.0 / (embedding_length + num_classes)) ** 0.5
    weight_t = jax.random.uniform(
        kw, (embedding_length, num_classes), jnp.float32, -limit_w, limit_w
    ).astype(dtype)
    limit_b = 1.0 / (embedding_length ** 0.5)
    bias = jax.random.uniform(kb, (num_classes,), jnp.float32, -limit_b, limit_b)
    return weight_t, bias


if __name__ == "__main__":
    # TODO(synk): the LanguageModel/MultiEncoder encoder itself is an external
    # transformer; its output is modeled here as a precomputed [B, E] embedding.
    root = jax.random.PRNGKey(0)
    k1, k2, k3, k4 = jax.random.split(root, 4)
    HI = jax.lax.Precision.HIGHEST

    # --- Case 1: module defaults (num_classes=1), tiny batch, f32, grid=(1,) --
    B, E, C = 8, 128, 1
    kx, kp = jax.random.split(k1)
    x = jax.random.normal(kx, (B, E), dtype=jnp.float32)
    w_t, b = init_params(kp, E, C)
    out = jax.block_until_ready(text_regressor_decode(x, w_t, b))
    ref = jnp.squeeze(jnp.dot(x, w_t, precision=HI) + b.reshape(1, C))
    assert out.shape == (B,)
    assert out.dtype == jnp.float32
    assert jnp.allclose(out, ref, atol=1e-4, rtol=1e-4)

    # --- Case 2: ragged batch, bf16 activations, multi-block grid + partial
    #     tail block (B % tile_b != 0) without any wrapper-side padding --------
    B, E, C = 200, 256, 1
    kx, kp = jax.random.split(k2)
    x = jax.random.normal(kx, (B, E), dtype=jnp.float32).astype(jnp.bfloat16)
    w_t, b = init_params(kp, E, C, dtype=jnp.bfloat16)
    out = jax.block_until_ready(text_regressor_decode(x, w_t, b, max_tile_b=64))
    ref = jnp.squeeze(
        jnp.dot(x.astype(jnp.float32), w_t.astype(jnp.float32), precision=HI)
        + b.reshape(1, C))
    assert out.shape == (B,)
    assert out.dtype == jnp.float32
    assert jnp.allclose(out, ref, atol=1e-3, rtol=1e-3)

    # --- Case 3: multi-class head (num_classes=3), MXU + VMEM-bias path -------
    B, E, C = 16, 128, 3
    kx, kp = jax.random.split(k3)
    x = jax.random.normal(kx, (B, E), dtype=jnp.float32)
    w_t, b = init_params(kp, E, C)
    out = jax.block_until_ready(text_regressor_decode(x, w_t, b))
    ref = jnp.squeeze(jnp.dot(x, w_t, precision=HI) + b.reshape(1, C))
    assert out.shape == (B, C)
    assert jnp.allclose(out, ref, atol=2e-2, rtol=2e-2)

    # --- Case 4: batch smaller than a sublane (B=5) -> full-extent block ------
    B, E, C = 5, 128, 1
    kx, kp = jax.random.split(k4)
    x = jax.random.normal(kx, (B, E), dtype=jnp.float32)
    w_t, b = init_params(kp, E, C)
    out = jax.block_until_ready(text_regressor_decode(x, w_t, b))
    ref = jnp.squeeze(jnp.dot(x, w_t, precision=HI) + b.reshape(1, C))
    assert out.shape == (B,)
    assert jnp.allclose(out, ref, atol=1e-4, rtol=1e-4)

    print("KERNEL_OK")
</pallas_src>

<mosaic_0001>
module attributes {stable_mosaic.version = 11 : i64} {
  func.func @_head_scalar_kernel(%arg0: i32, %arg1: memref<8x128xf32, #tpu.memory_space<vmem>>, %arg2: memref<1x128xf32, #tpu.memory_space<vmem>>, %arg3: memref<1x1xf32, #tpu.memory_space<smem>>, %arg4: memref<8x1xf32, #tpu.memory_space<vmem>>) attributes {dimension_semantics = [#tpu.dimension_semantics<parallel>], iteration_bounds = array<i64: 1>, scalar_prefetch = 0 : i64, scratch_operands = 0 : i64, tpu.core_type = #tpu.core_type<tc>, window_params = [{transform_indices = @transform_0, window_bounds = array<i64: 8, 128>}, {pipeline_mode = #tpu.pipeline_mode<synchronous>, transform_indices = @transform_1, window_bounds = array<i64: 1, 128>}, {transform_indices = @transform_2, window_bounds = array<i64: 1, 1>}, {transform_indices = @transform_3, window_bounds = array<i64: 8, 1>}]} {
    %c0 = arith.constant 0 : index
    %c0_0 = arith.constant 0 : index
    %0 = vector.load %arg1[%c0, %c0_0] : memref<8x128xf32, #tpu.memory_space<vmem>>, vector<8x128xf32>
    %c0_1 = arith.constant 0 : index
    %c0_2 = arith.constant 0 : index
    %1 = vector.load %arg2[%c0_1, %c0_2] : memref<1x128xf32, #tpu.memory_space<vmem>>, vector<1x128xf32>
    %2 = vector.broadcast %1 : vector<1x128xf32> to vector<8x128xf32>
    %3 = arith.mulf %0, %2 : vector<8x128xf32>
    %cst = arith.constant dense<0.000000e+00> : vector<8xf32>
    %4 = vector.multi_reduction <add>, %3, %cst [1] : vector<8x128xf32> to vector<8xf32>
    %5 = vector.shape_cast %4 : vector<8xf32> to vector<8x1xf32>
    %c0_3 = arith.constant 0 : index
    %c0_4 = arith.constant 0 : index
    %6 = memref.load %arg3[%c0_3, %c0_4] : memref<1x1xf32, #tpu.memory_space<smem>>
    %7 = vector.broadcast %6 : f32 to vector<8x1xf32>
    %8 = arith.addf %5, %7 : vector<8x1xf32>
    %c0_5 = arith.constant 0 : index
    %c0_6 = arith.constant 0 : index
    %9 = vector.load %arg4[%c0_5, %c0_6] : memref<8x1xf32, #tpu.memory_space<vmem>>, vector<8x1xf32>
    tpu.vector_store %arg4[%c0_5, %c0_6], %8 {strides = array<i32>} : memref<8x1xf32, #tpu.memory_space<vmem>>, vector<8x1xf32>,
    return
  }
  func.func @transform_0(%arg0: i32) -> (i32, i32) {
    %c0_i32 = arith.constant 0 : i32
    %c0_i32_0 = arith.constant 0 : i32
    return %arg0, %c0_i32 : i32, i32
  }
  func.func @transform_1(%arg0: i32) -> (i32, i32) {
    %c0_i32 = arith.constant 0 : i32
    %c0_i32_0 = arith.constant 0 : i32
    %c0_i32_1 = arith.constant 0 : i32
    return %c0_i32, %c0_i32_0 : i32, i32
  }
  func.func @transform_2(%arg0: i32) -> (i32, i32) {
    %c0_i32 = arith.constant 0 : i32
    %c0_i32_0 = arith.constant 0 : i32
    %c0_i32_1 = arith.constant 0 : i32
    return %c0_i32, %c0_i32_0 : i32, i32
  }
  func.func @transform_3(%arg0: i32) -> (i32, i32) {
    %c0_i32 = arith.constant 0 : i32
    %c0_i32_0 = arith.constant 0 : i32
    return %arg0, %c0_i32 : i32, i32
  }
}

</mosaic_0001>

<bundles_post_ra>
// kernel: tpu_custom_call.1
= control target key start
LH: loop header
LB: loop body
LE: loop exit
PB: predicated region body
PF: predicated region fallthrough
CT: control target
= control target key end

     0   :  { %9 = vsyncpa [#allocation4], 0  ;;  %s75_s15 = smov [#allocation3]   ;;  %s108_s0 = inlined_call_operand.hbm [shape: f32[8,128], index: 0, kind: input, shape index: {}]   ;;  %s109_s1 = inlined_call_operand.vmem [shape: f32[1,128], index: 1, kind: input, shape index: {}]   ;;  %s110_s2 = inlined_call_operand.<no memory space> [shape: f32[1,1], index: 2, kind: input, shape index: {}]   ;;  %s111_s3 = inlined_call_operand.vmem [shape: f32[8,1], index: 3, kind: output, shape index: {}]  }
   0x1   :  { %s15_s14 = sshll.u32 %s108_s0, 4  ;;  %s17_s16 = sshll.u32 %s75_s15, 4  ;;  %s16_s14 = int_to_ptr.hbm [resolvable:$true] %s15_s14  ;;  %s18_s16 = int_to_ptr.vmem [resolvable:$true] %s17_s16 }
   0x2   :  { %20 = dma.hbm_to_vmem [thread:$0]  %s16_s14, 128, %s18_s16, [#allocation4]  }
   0x3   :  { %73 = dma.done.wait [#allocation4], 128  }
   0x4   :  { %74 = vsyncadd [#allocation4], 4294967168  ;;  %v29_v0 = vld [vmem:[#allocation3] sm:$0xff]  ;;  %v38_v3 = vstv %s110_s2  ;;  %vm40_vm0 = vcmask 7168  }
   0x5   :  { %v48_v1 = vld [vmem:[%s109_s1] ss:$0 sm:$0xff] }
   0x6   :  { %v34_v2 = vmul.f32 %v48_v1, %v29_v0 }
   0x8   :  { %35 = vadd.xlane.f32.xlu0 %v34_v2 }
  0x7b   :  { %v36_v4 = vpop.xlane.xlu0 %35 }
  0x7c   :  { %v39_v5 = vadd.f32 %v38_v3, %v36_v4 }
  0x7e   :  { %41 = vst.msk [vmem:[%s111_s3] sm:$0xff] %vm40_vm0, %v39_v5 }
  0x7f   :  { %46 = vsyncpa [#allocation4], 1 }

</bundles_post_ra>
